<compile_context>
chip_gen: v5e
topology: v5e:2x2
jax: 0.10.0
libtpu: 0.0.40
codegen_flags: <defaults>
</compile_context>

<pallas_src>
import jax
import jax.numpy as jnp
from jax.experimental import pallas as pl
from jax.experimental.pallas import tpu as pltpu


def _round_up(x, m):
    return ((x + m - 1) // m) * m


def _padded_vmem_bytes(shape, itemsize):
    """Bytes a 2-D block occupies in VMEM after (8, 128) tile padding."""
    rows, cols = (shape if len(shape) == 2 else (1, shape[-1]))
    return _round_up(rows, 8) * _round_up(cols, 128) * itemsize


def _kgnn_head_kernel(batch_ref, h_ref, wt_ref, b_ref, inv_cnt_ref, out_ref, sum_acc):
    """One grid step pools a tile of `tile_n` nodes; the last step applies the linear.

    batch_ref:   [1, tile_n]    int32     graph id per node (-1 marks padded nodes)
    h_ref:       [tile_n, H]    bfloat16  node-representation tile (gnn output)
    wt_ref:      [H, E_pad]     float32   Linear weight, pre-transposed, lane-padded
    b_ref:       [1, E_pad]     float32   Linear bias, lane-padded
    inv_cnt_ref: [B_pad, 1]     float32   1 / max(node count, 1) per graph
    out_ref:     [B_pad, E_pad] float32   graph representations (written on last step)
    sum_acc:     [B_pad, H]     float32   running per-graph feature sums (VMEM scratch)
    """
    k = pl.program_id(0)
    b_pad = sum_acc.shape[0]

    @pl.when(k == 0)
    def _init():
        sum_acc[...] = jnp.zeros_like(sum_acc)

    batch = batch_ref[0, :]                                           # [tile_n]
    # Column iota [B_pad, 1]; broadcasting happens inside the compare, so the
    # per-step iota cost is O(B_pad), not O(B_pad * tile_n).
    graph_ids = jax.lax.broadcasted_iota(jnp.int32, (b_pad, 1), 0)
    # Padded nodes carry batch id -1 and never match a (non-negative) graph id.
    onehot = (batch[None, :] == graph_ids).astype(jnp.bfloat16)       # [B_pad, tile_n]
    sum_acc[...] += jnp.dot(onehot, h_ref[...],
                            preferred_element_type=jnp.float32)       # MXU, f32 acc

    @pl.when(k == pl.num_programs(0) - 1)
    def _finalize():
        pooled = sum_acc[...] * inv_cnt_ref[...]                      # [B_pad, H]
        out = jnp.dot(pooled, wt_ref[...],
                      preferred_element_type=jnp.float32) + b_ref[...]
        out_ref[...] = out.astype(out_ref.dtype)


def kgnn_head(node_representation, batch, weight, bias, num_graphs, *, tile_n=4096):
    """global_mean_pool(node_representation, batch) @ weight.T + bias via Pallas.

    `batch` must hold graph ids in [0, num_graphs) (PyG convention); ids outside
    that range would be silently dropped by the final slice.
    """
    n_nodes, hidden = node_representation.shape
    emb_dim = weight.shape[0]

    # Node tiles: big (default 4096 rows) to amortize per-step pipeline overhead.
    # A [4096, 32] bf16 tile is ~1 MiB even after lane padding to 128.
    tile_n = _round_up(max(tile_n, 128), 128)
    tile_n = min(tile_n, _round_up(max(n_nodes, 1), 128))
    n_pad = _round_up(max(n_nodes, 1), tile_n)
    e_pad = _round_up(max(emb_dim, 1), 128)      # lane-dense output stores
    b_pad = _round_up(max(num_graphs, 1), 8)
    grid_n = n_pad // tile_n

    # bf16 node-feature stream (halves HBM bytes); accumulation stays f32.
    h = jnp.asarray(node_representation, jnp.bfloat16)
    h = jnp.pad(h, ((0, n_pad - n_nodes), (0, 0)))
    batch_i32 = jnp.asarray(batch, jnp.int32)
    batch_2d = jnp.pad(batch_i32, (0, n_pad - n_nodes),
                       constant_values=-1).reshape(1, n_pad)
    w_t = jnp.pad(jnp.asarray(weight, jnp.float32).T,
                  ((0, 0), (0, e_pad - emb_dim)))                     # [H, E_pad]
    b_2d = jnp.pad(jnp.asarray(bias, jnp.float32),
                   (0, e_pad - emb_dim)).reshape(1, e_pad)            # [1, E_pad]
    # Per-graph node counts precomputed outside the kernel (O(N), free in XLA).
    counts = jnp.zeros((b_pad,), jnp.float32).at[batch_i32].add(1.0)
    inv_counts = (1.0 / jnp.maximum(counts, 1.0)).reshape(b_pad, 1)   # empty graph -> bias row

    flops = 2 * b_pad * n_pad * hidden + 2 * b_pad * hidden * e_pad
    bytes_accessed = (2 * n_pad * hidden + 4 * n_pad + 4 * hidden * e_pad
                      + 4 * e_pad + 4 * b_pad + 4 * b_pad * e_pad)

    # Tight VMEM budget: double-buffered streamed tiles + resident operands
    # + accumulator + one-hot temp, with ~2x headroom -- a few MiB, leaving the
    # compiler room on every generation (incl. v7x's smaller 64 MiB VMEM).
    vmem_needed = (
        2 * _padded_vmem_bytes((tile_n, hidden), 2)      # h tiles (bf16, double-buffered)
        + 2 * _padded_vmem_bytes((1, tile_n), 4)         # batch-id tiles
        + 2 * _padded_vmem_bytes((hidden, e_pad), 4)     # weight (resident)
        + 2 * _padded_vmem_bytes((1, e_pad), 4)          # bias
        + 2 * _padded_vmem_bytes((b_pad, 1), 4)          # 1/counts
        + 2 * _padded_vmem_bytes((b_pad, e_pad), 4)      # output
        + _padded_vmem_bytes((b_pad, hidden), 4)         # sum_acc scratch
        + _padded_vmem_bytes((b_pad, tile_n), 2)         # one-hot temp
    )
    vmem_limit = int(min(2 * vmem_needed + (1 << 20), 32 << 20))

    out = pl.pallas_call(
        _kgnn_head_kernel,
        out_shape=jax.ShapeDtypeStruct((b_pad, e_pad), jnp.float32),
        grid=(grid_n,),
        in_specs=[
            pl.BlockSpec((1, tile_n), lambda k: (0, k)),        # batch ids, streamed
            pl.BlockSpec((tile_n, hidden), lambda k: (k, 0)),   # node features, streamed
            pl.BlockSpec((hidden, e_pad), lambda k: (0, 0)),    # weight, resident
            pl.BlockSpec((1, e_pad), lambda k: (0, 0)),         # bias, resident
            pl.BlockSpec((b_pad, 1), lambda k: (0, 0)),         # 1/counts, resident
        ],
        out_specs=pl.BlockSpec((b_pad, e_pad), lambda k: (0, 0)),
        scratch_shapes=[
            pltpu.VMEM((b_pad, hidden), jnp.float32),           # per-graph feature sums
        ],
        compiler_params=pltpu.CompilerParams(
            dimension_semantics=("arbitrary",),                 # node-tile reduction axis
            vmem_limit_bytes=vmem_limit,
        ),
        cost_estimate=pl.CostEstimate(
            flops=flops, transcendentals=0, bytes_accessed=bytes_accessed),
    )(batch_2d, h, w_t, b_2d, inv_counts)

    return out[:num_graphs, :emb_dim]


def reference_head(node_representation, batch, weight, bias, num_graphs):
    """Pure-JAX reference: global_mean_pool + Linear."""
    onehot = (batch[None, :] == jnp.arange(num_graphs)[:, None]).astype(jnp.float32)
    counts = jnp.maximum(onehot.sum(axis=1, keepdims=True), 1.0)
    pooled = (onehot @ node_representation) / counts
    return pooled @ weight.T + bias[None, :]


if __name__ == "__main__":
    # Hidden width as defined by the module: sum of num_kernel*_Nhop.
    num_kernel1_Nhop = num_kernel2_Nhop = num_kernel3_Nhop = num_kernel4_Nhop = 8
    hidden = num_kernel1_Nhop + num_kernel2_Nhop + num_kernel3_Nhop + num_kernel4_Nhop  # 32
    graph_embedding_dim = 5

    # Several node tiles (n_pad = 12288 -> 3 grid steps at tile_n = 4096) so the
    # init / accumulate / finalize phases and the padded last tile are exercised.
    n_nodes = 10000
    num_graphs = 7

    key = jax.random.PRNGKey(0)
    k_h, k_w, k_b = jax.random.split(key, 3)

    # node_representation stands in for the MolGCN (self.gnn) output.
    node_representation = jax.random.normal(k_h, (n_nodes, hidden), dtype=jnp.float32)
    # PyG-style sorted `batch` vector: contiguous segments per graph.
    sizes = [1800, 1500, 1300, 1700, 1200, 1400, 1100]   # sums to n_nodes
    batch = jnp.concatenate(
        [jnp.full((s,), i, dtype=jnp.int32) for i, s in enumerate(sizes)])

    # torch.nn.Linear default init: U(-1/sqrt(fan_in), +1/sqrt(fan_in)).
    bound = 1.0 / jnp.sqrt(jnp.float32(hidden))
    weight = jax.random.uniform(k_w, (graph_embedding_dim, hidden),
                                minval=-bound, maxval=bound, dtype=jnp.float32)
    bias = jax.random.uniform(k_b, (graph_embedding_dim,),
                              minval=-bound, maxval=bound, dtype=jnp.float32)

    out = kgnn_head(node_representation, batch, weight, bias, num_graphs)
    out = jax.block_until_ready(out)
    assert out.shape == (num_graphs, graph_embedding_dim)

    # Reference at matching input precision (kernel streams node features in bf16).
    ref_bf16 = reference_head(
        node_representation.astype(jnp.bfloat16).astype(jnp.float32),
        batch, weight, bias, num_graphs)
    assert jnp.allclose(out, ref_bf16, atol=1e-4, rtol=1e-4), \
        float(jnp.max(jnp.abs(out - ref_bf16)))

    # Sanity check vs the full-f32 reference (bf16 streaming error is tiny after
    # mean pooling over ~1e3 nodes per graph).
    ref_f32 = reference_head(node_representation, batch, weight, bias, num_graphs)
    assert jnp.allclose(out, ref_f32, atol=5e-3, rtol=5e-3), \
        float(jnp.max(jnp.abs(out - ref_f32)))

    print("KERNEL_OK")
</pallas_src>

<mosaic_0001>
module attributes {stable_mosaic.version = 11 : i64} {
  func.func @_kgnn_head_kernel(%arg0: i32, %arg1: memref<1x4096xi32, #tpu.memory_space<vmem>>, %arg2: memref<4096x32xbf16, #tpu.memory_space<vmem>>, %arg3: memref<32x128xf32, #tpu.memory_space<vmem>>, %arg4: memref<1x128xf32, #tpu.memory_space<vmem>>, %arg5: memref<8x1xf32, #tpu.memory_space<vmem>>, %arg6: memref<8x128xf32, #tpu.memory_space<vmem>>, %arg7: memref<8x32xf32, #tpu.memory_space<vmem>>) attributes {dimension_semantics = [#tpu.dimension_semantics<arbitrary>], iteration_bounds = array<i64: 3>, scalar_prefetch = 0 : i64, scratch_operands = 1 : i64, tpu.core_type = #tpu.core_type<tc>, window_params = [{transform_indices = @transform_0, window_bounds = array<i64: 1, 4096>}, {transform_indices = @transform_1, window_bounds = array<i64: 4096, 32>}, {pipeline_mode = #tpu.pipeline_mode<synchronous>, transform_indices = @transform_2, window_bounds = array<i64: 32, 128>}, {pipeline_mode = #tpu.pipeline_mode<synchronous>, transform_indices = @transform_3, window_bounds = array<i64: 1, 128>}, {pipeline_mode = #tpu.pipeline_mode<synchronous>, transform_indices = @transform_4, window_bounds = array<i64: 8, 1>}, {pipeline_mode = #tpu.pipeline_mode<synchronous>, transform_indices = @transform_5, window_bounds = array<i64: 8, 128>}]} {
    %c0_i32 = arith.constant 0 : i32
    %0 = arith.cmpi eq, %arg0, %c0_i32 : i32
    %1 = arith.extui %0 : i1 to i32
    %c0_i32_0 = arith.constant 0 : i32
    %2 = arith.cmpi ne, %1, %c0_i32_0 : i32
    scf.if %2 {
      %cst_9 = arith.constant 0.000000e+00 : f32
      %21 = vector.broadcast %cst_9 : f32 to vector<8x32xf32>
      %c0_10 = arith.constant 0 : index
      %c0_11 = arith.constant 0 : index
      %22 = vector.load %arg7[%c0_10, %c0_11] : memref<8x32xf32, #tpu.memory_space<vmem>>, vector<8x32xf32>
      tpu.vector_store %arg7[%c0_10, %c0_11], %21 {strides = array<i32>} : memref<8x32xf32, #tpu.memory_space<vmem>>, vector<8x32xf32>,
    } else {
    }
    %c0 = arith.constant 0 : index
    %c0_1 = arith.constant 0 : index
    %3 = vector.load %arg1[%c0, %c0_1] : memref<1x4096xi32, #tpu.memory_space<vmem>>, vector<1x4096xi32>
    %4 = vector.shape_cast %3 : vector<1x4096xi32> to vector<4096xi32>
    %5 = tpu.iota {dimensions = array<i32: 0>} : vector<8x1xi32>
    %6 = vector.shape_cast %4 : vector<4096xi32> to vector<1x4096xi32>
    %7 = vector.broadcast %6 : vector<1x4096xi32> to vector<8x4096xi32>
    %8 = vector.broadcast %5 : vector<8x1xi32> to vector<8x4096xi32>
    %9 = arith.cmpi eq, %7, %8 : vector<8x4096xi32>
    %10 = arith.extui %9 : vector<8x4096xi1> to vector<8x4096xi32>
    %11 = arith.sitofp %10 : vector<8x4096xi32> to vector<8x4096xf32>
    %12 = arith.truncf %11 : vector<8x4096xf32> to vector<8x4096xbf16>
    %c0_2 = arith.constant 0 : index
    %c0_3 = arith.constant 0 : index
    %13 = vector.load %arg7[%c0_2, %c0_3] : memref<8x32xf32, #tpu.memory_space<vmem>>, vector<8x32xf32>
    %c0_4 = arith.constant 0 : index
    %c0_5 = arith.constant 0 : index
    %14 = vector.load %arg2[%c0_4, %c0_5] : memref<4096x32xbf16, #tpu.memory_space<vmem>>, vector<4096x32xbf16>
    %cst = arith.constant dense<0.000000e+00> : vector<8x32xf32>
    %15 = tpu.matmul %12, %14, %cst {dimension_numbers = #tpu.dot_dimension_numbers<[1], [0], [0], [1], [0, 0, 1, 1], [], []>} : vector<8x4096xbf16>, vector<4096x32xbf16>, vector<8x32xf32> -> vector<8x32xf32>
    %16 = arith.addf %13, %15 : vector<8x32xf32>
    %c0_6 = arith.constant 0 : index
    %c0_7 = arith.constant 0 : index
    %17 = vector.load %arg7[%c0_6, %c0_7] : memref<8x32xf32, #tpu.memory_space<vmem>>, vector<8x32xf32>
    tpu.vector_store %arg7[%c0_6, %c0_7], %16 {strides = array<i32>} : memref<8x32xf32, #tpu.memory_space<vmem>>, vector<8x32xf32>,
    %c2_i32 = arith.constant 2 : i32
    %18 = arith.cmpi eq, %arg0, %c2_i32 : i32
    %19 = arith.extui %18 : i1 to i32
    %c0_i32_8 = arith.constant 0 : i32
    %20 = arith.cmpi ne, %19, %c0_i32_8 : i32
    scf.if %20 {
      %c0_9 = arith.constant 0 : index
      %c0_10 = arith.constant 0 : index
      %21 = vector.load %arg7[%c0_9, %c0_10] : memref<8x32xf32, #tpu.memory_space<vmem>>, vector<8x32xf32>
      %c0_11 = arith.constant 0 : index
      %c0_12 = arith.constant 0 : index
      %22 = vector.load %arg5[%c0_11, %c0_12] : memref<8x1xf32, #tpu.memory_space<vmem>>, vector<8x1xf32>
      %23 = vector.broadcast %22 : vector<8x1xf32> to vector<8x32xf32>
      %24 = arith.mulf %21, %23 : vector<8x32xf32>
      %c0_13 = arith.constant 0 : index
      %c0_14 = arith.constant 0 : index
      %25 = vector.load %arg3[%c0_13, %c0_14] : memref<32x128xf32, #tpu.memory_space<vmem>>, vector<32x128xf32>
      %cst_15 = arith.constant dense<0.000000e+00> : vector<8x128xf32>
      %26 = tpu.matmul %24, %25, %cst_15 {dimension_numbers = #tpu.dot_dimension_numbers<[1], [0], [0], [1], [0, 0, 1, 1], [], []>} : vector<8x32xf32>, vector<32x128xf32>, vector<8x128xf32> -> vector<8x128xf32>
      %c0_16 = arith.constant 0 : index
      %c0_17 = arith.constant 0 : index
      %27 = vector.load %arg4[%c0_16, %c0_17] : memref<1x128xf32, #tpu.memory_space<vmem>>, vector<1x128xf32>
      %28 = vector.broadcast %27 : vector<1x128xf32> to vector<8x128xf32>
      %29 = arith.addf %26, %28 : vector<8x128xf32>
      %c0_18 = arith.constant 0 : index
      %c0_19 = arith.constant 0 : index
      %30 = vector.load %arg6[%c0_18, %c0_19] : memref<8x128xf32, #tpu.memory_space<vmem>>, vector<8x128xf32>
      tpu.vector_store %arg6[%c0_18, %c0_19], %29 {strides = array<i32>} : memref<8x128xf32, #tpu.memory_space<vmem>>, vector<8x128xf32>,
    } else {
    }
    return
  }
  func.func @transform_0(%arg0: i32) -> (i32, i32) {
    %c0_i32 = arith.constant 0 : i32
    %c0_i32_0 = arith.constant 0 : i32
    return %c0_i32, %arg0 : i32, i32
  }
  func.func @transform_1(%arg0: i32) -> (i32, i32) {
    %c0_i32 = arith.constant 0 : i32
    %c0_i32_0 = arith.constant 0 : i32
    return %arg0, %c0_i32 : i32, i32
  }
  func.func @transform_2(%arg0: i32) -> (i32, i32) {
    %c0_i32 = arith.constant 0 : i32
    %c0_i32_0 = arith.constant 0 : i32
    %c0_i32_1 = arith.constant 0 : i32
    return %c0_i32, %c0_i32_0 : i32, i32
  }
  func.func @transform_3(%arg0: i32) -> (i32, i32) {
    %c0_i32 = arith.constant 0 : i32
    %c0_i32_0 = arith.constant 0 : i32
    %c0_i32_1 = arith.constant 0 : i32
    return %c0_i32, %c0_i32_0 : i32, i32
  }
  func.func @transform_4(%arg0: i32) -> (i32, i32) {
    %c0_i32 = arith.constant 0 : i32
    %c0_i32_0 = arith.constant 0 : i32
    %c0_i32_1 = arith.constant 0 : i32
    return %c0_i32, %c0_i32_0 : i32, i32
  }
  func.func @transform_5(%arg0: i32) -> (i32, i32) {
    %c0_i32 = arith.constant 0 : i32
    %c0_i32_0 = arith.constant 0 : i32
    %c0_i32_1 = arith.constant 0 : i32
    return %c0_i32, %c0_i32_0 : i32, i32
  }
}

</mosaic_0001>

<bundles_post_ra>
// kernel: tpu_custom_call.1
= control target key start
LH: loop header
LB: loop body
LE: loop exit
PB: predicated region body
PF: predicated region fallthrough
CT: control target
= control target key end

     0   :  { %10 = vsyncpa [#allocation4], 0  ;;  %s4457_s18 = smov 0   ;;  %s5125_s0 = inlined_call_operand.vmem [shape: s32[1,12288], index: 0, kind: input, shape index: {}]   ;;  %s5126_s1 = inlined_call_operand.vmem [shape: bf16[12288,32], index: 1, kind: input, shape index: {}]   ;;  %s5127_s2 = inlined_call_operand.vmem [shape: f32[32,128], index: 2, kind: input, shape index: {}]   ;;  %s5128_s3 = inlined_call_operand.vmem [shape: f32[1,128], index: 3, kind: input, shape index: {}]   ;;  %s5129_s4 = inlined_call_operand.vmem [shape: f32[8,1], index: 4, kind: input, shape index: {}]   ;;  %s5130_s5 = inlined_call_operand.hbm [shape: f32[8,128], index: 5, kind: output, shape index: {}]  }
   0x1 LB: > { %s4463_s19 = sadd.s32 4294967295, %s4421_s18   ;;  %p2976_p0 = scmp.ge.s32.totalorder %s4421_s18, 1  ;;  %s4421_s18 = sphi %s4457_s18, %s16_s18  }
   0x2   : > { %p194_p1 = scmp.lt.s32.totalorder %s4421_s18, 4 }
   0x4   : > { %p195_p2 = pnand %p2976_p0, %p194_p1 }
   0x5   : > { %s2977_s20 = sshll.u32 (!%p195_p2), %s4463_s19, 5  ;;  %s2978_s21 = sshll.u32 (!%p195_p2), %s4463_s19, 9 }
   0x6   : > { %198 = sbr.rel (%p195_p2) target bundleno = 672 (0x2a0), region = 40  ;;  %p222_p3 = scmp.lt.s32.totalorder (!%p195_p2), %s2977_s20, 95 }
   0x7   : > { %p227_p4 = scmp.lt.s32.totalorder (!%p195_p2), %s2978_s21, 1535  ;;  %p2980_p5 = scmp.ne.s32.totalorder (!%p195_p2), %s4463_s19, 0 }
   0xb   : > { %s5192_s20 = smov (!%p222_p3, %s2977_s20), 95  ;;  %s5194_s21 = smov (!%p227_p4, %s2978_s21), 1535 }
   0xc   : > { %s4472_s24 = scalar_lea.vmem %s5125_s0, %s5192_s20  ;;  %s2979_s25 = sshll.u32 %s5194_s21, 2 }
   0xd   : > { %s4477_s28 = scalar_lea.vmem %s5126_s1, %s2979_s25  ;;  %235 = sbr.rel (%p2980_p5) target bundleno = 20 (0x14), region = 44 }
  0x12   : > { %vm236_vm0 = vcmask 261120   ;;  %v4423_v0 = vmov 0.0  }
  0x13   : > { %237 = vst.msk [vmem:[#allocation2] sm:$0xff] %vm236_vm0, %v4423_v0 }
  0x14 PF: > { %v4114_v1 = vld [vmem:[%s4477_s28 + $0x38] sm:$0xff]  ;;  %v4113_v5 = vld [vmem:[%s4477_s28 + $0x30] sm:$0xff]  ;;  %v4112_v9 = vld [vmem:[%s4477_s28 + $0x28] sm:$0xff]  ;;  %v242_v23 = vlaneseq  ;;  %v4424_v52 = vmov 1.0|1.0   ;;  %p4101_p6 = scmp.ne.s32.totalorder %s4463_s19, 2 }
  0x15   : > { %v4122_v2 = vld [vmem:[%s4477_s28 + $0x78] sm:$0xff]  ;;  %2453 = vmatpush.bf16.msra.mxu0 %v4114_v1  ;;  %v4121_v6 = vld [vmem:[%s4477_s28 + $0x70] sm:$0xff]  ;;  %v4120_v10 = vld [vmem:[%s4477_s28 + $0x68] sm:$0xff] }
  0x16   : > { %v4130_v3 = vld [vmem:[%s4477_s28 + $0xb8] sm:$0xff]  ;;  %2466 = vmatpush.bf16.msra.mxu1 %v4122_v2  ;;  %v4129_v7 = vld [vmem:[%s4477_s28 + $0xb0] sm:$0xff]  ;;  %v4128_v11 = vld [vmem:[%s4477_s28 + $0xa8] sm:$0xff]  ;;  %v4509_v29 = vshrl.u32 %v242_v23, 7 }
  0x17   : > { %v4138_v4 = vld [vmem:[%s4477_s28 + $0xf8] sm:$0xff]  ;;  %2479 = vmatpush.bf16.msra.mxu2 %v4130_v3  ;;  %v4137_v8 = vld [vmem:[%s4477_s28 + $0xf0] sm:$0xff]  ;;  %v4136_v12 = vld [vmem:[%s4477_s28 + $0xe8] sm:$0xff] }
  0x18   : > { %2492 = vmatpush.bf16.msra.mxu3 %v4138_v4  ;;  %v4111_v13 = vld [vmem:[%s4477_s28 + $0x20] sm:$0xff]  ;;  %v4110_v17 = vld [vmem:[%s4477_s28 + $0x18] sm:$0xff]  ;;  %v4109_v21 = vld [vmem:[%s4477_s28 + $0x10] sm:$0xff] }
  0x19   : > { %2454 = vmatpush.bf16.msra.mxu0 %v4113_v5  ;;  %v4119_v14 = vld [vmem:[%s4477_s28 + $0x60] sm:$0xff]  ;;  %v4118_v18 = vld [vmem:[%s4477_s28 + $0x58] sm:$0xff]  ;;  %v4117_v22 = vld [vmem:[%s4477_s28 + $0x50] sm:$0xff] }
  0x1a   : > { %2467 = vmatpush.bf16.msra.mxu1 %v4121_v6  ;;  %v4127_v15 = vld [vmem:[%s4477_s28 + $0xa0] sm:$0xff]  ;;  %v4126_v19 = vld [vmem:[%s4477_s28 + $0x98] sm:$0xff]  ;;  %v4125_v24 = vld [vmem:[%s4477_s28 + $0x90] sm:$0xff] }
  0x1b   : > { %2480 = vmatpush.bf16.msra.mxu2 %v4129_v7  ;;  %v4135_v16 = vld [vmem:[%s4477_s28 + $0xe0] sm:$0xff]  ;;  %v4134_v20 = vld [vmem:[%s4477_s28 + $0xd8] sm:$0xff]  ;;  %v4133_v25 = vld [vmem:[%s4477_s28 + $0xd0] sm:$0xff] }
  0x1c   : > { %2493 = vmatpush.bf16.msra.mxu3 %v4137_v8  ;;  %v4505_v26 = vld [vmem:[%s4472_s24] sm:$0xff]  ;;  %v4108_v27 = vld [vmem:[%s4477_s28 + $0x8] sm:$0xff]  ;;  %v4146_v42 = vld [vmem:[%s4477_s28 + $0x138] sm:$0xff] }
  0x1d   : > { %2455 = vmatpush.bf16.msra.mxu0 %v4112_v9  ;;  %v4116_v28 = vld [vmem:[%s4477_s28 + $0x48] sm:$0xff]  ;;  %v246_v30 = vperm.slane %v4505_v26, 2  ;;  %v244_v33 = vperm.slane %v4505_v26, 0  ;;  %v247_v34 = vperm.slane %v4505_v26, 3  ;;  %v245_v35 = vperm.slane %v4505_v26, 1  ;;  %v4107_v36 = vld [vmem:[%s4477_s28] sm:$0xff] }
  0x1e   : > { %2468 = vmatpush.bf16.msra.mxu1 %v4120_v10  ;;  %v4124_v31 = vld [vmem:[%s4477_s28 + $0x88] sm:$0xff]  ;;  %v4115_v37 = vld [vmem:[%s4477_s28 + $0x40] sm:$0xff]  ;;  %v4154_v43 = vld [vmem:[%s4477_s28 + $0x178] sm:$0xff]  ;;  %v250_v7 = vperm.slane %v4505_v26, 6  ;;  %v248_v10 = vperm.slane %v4505_v26, 4 }
  0x1f   : > { %2481 = vmatpush.bf16.msra.mxu2 %v4128_v11  ;;  %v4132_v32 = vld [vmem:[%s4477_s28 + $0xc8] sm:$0xff]  ;;  %vm4520_vm1 = vcmp.eq.s32.totalorder %v246_v30, %v4509_v29  ;;  %v4123_v39 = vld [vmem:[%s4477_s28 + $0x80] sm:$0xff]  ;;  %vm4527_vm2 = vcmp.eq.s32.totalorder %v244_v33, %v4509_v29  ;;  %vm4534_vm3 = vcmp.eq.s32.totalorder %v247_v34, %v4509_v29  ;;  %v4162_v45 = vld [vmem:[%s4477_s28 + $0x1b8] sm:$0xff]  ;;  %vm4544_vm5 = vcmp.eq.s32.totalorder %v245_v35, %v4509_v29 }
  0x20   : > { %2494 = vmatpush.bf16.msra.mxu3 %v4136_v12  ;;  %v4131_v40 = vld [vmem:[%s4477_s28 + $0xc0] sm:$0xff]  ;;  %v4170_v46 = vld [vmem:[%s4477_s28 + $0x1f8] sm:$0xff]  ;;  %vm4041_vm4 = vmpackc.low %vm4520_vm1, %vm4520_vm1  ;;  %v251_v11 = vperm.slane %v4505_v26, 7  ;;  %v249_v12 = vperm.slane %v4505_v26, 5  ;;  %vm4597_vm9 = vcmp.eq.s32.totalorder %v250_v7, %v4509_v29  ;;  %vm4604_vm10 = vcmp.eq.s32.totalorder %v248_v10, %v4509_v29 }
  0x21   : > { %2456 = vmatpush.bf16.msra.mxu0 %v4111_v13  ;;  %vm4037_vm6 = vmpackc.low %vm4527_vm2, %vm4527_vm2  ;;  %v4145_v48 = vld [vmem:[%s4477_s28 + $0x130] sm:$0xff]  ;;  %v4144_v53 = vld [vmem:[%s4477_s28 + $0x128] sm:$0xff] }
  0x22   : > { %2469 = vmatpush.bf16.msra.mxu1 %v4119_v14  ;;  %vm4043_vm7 = vmpackc.low %vm4534_vm3, %vm4534_vm3  ;;  %v4153_v49 = vld [vmem:[%s4477_s28 + $0x170] sm:$0xff]  ;;  %v4152_v54 = vld [vmem:[%s4477_s28 + $0x168] sm:$0xff]  ;;  %vm4611_vm11 = vcmp.eq.s32.totalorder %v251_v11, %v4509_v29  ;;  %vm4621_vm13 = vcmp.eq.s32.totalorder %v249_v12, %v4509_v29 }
  0x23   : > { %2482 = vmatpush.bf16.msra.mxu2 %v4127_v15  ;;  %vm4039_vm8 = vmpackc.low %vm4544_vm5, %vm4544_vm5  ;;  %v4161_v50 = vld [vmem:[%s4477_s28 + $0x1b0] sm:$0xff]  ;;  %v4160_v55 = vld [vmem:[%s4477_s28 + $0x1a8] sm:$0xff] }
  0x24   : > { %2495 = vmatpush.bf16.msra.mxu3 %v4135_v16  ;;  %v4169_v51 = vld [vmem:[%s4477_s28 + $0x1f0] sm:$0xff]  ;;  %v4168_v56 = vld [vmem:[%s4477_s28 + $0x1e8] sm:$0xff]  ;;  %v4143_v57 = vld [vmem:[%s4477_s28 + $0x120] sm:$0xff] }
  0x25   : > { %2457 = vmatpush.bf16.msra.mxu0 %v4110_v17  ;;  %v4151_v58 = vld [vmem:[%s4477_s28 + $0x160] sm:$0xff]  ;;  %v4142_v61 = vld [vmem:[%s4477_s28 + $0x118] sm:$0xff]  ;;  %v4141_v1 = vld [vmem:[%s4477_s28 + $0x110] sm:$0xff] }
  0x26   : > { %2470 = vmatpush.bf16.msra.mxu1 %v4118_v18  ;;  %v4159_v59 = vld [vmem:[%s4477_s28 + $0x1a0] sm:$0xff]  ;;  %v4150_v62 = vld [vmem:[%s4477_s28 + $0x158] sm:$0xff]  ;;  %v4149_v2 = vld [vmem:[%s4477_s28 + $0x150] sm:$0xff] }
  0x27   : > { %2483 = vmatpush.bf16.msra.mxu2 %v4126_v19  ;;  %v4167_v60 = vld [vmem:[%s4477_s28 + $0x1e0] sm:$0xff]  ;;  %v4158_v63 = vld [vmem:[%s4477_s28 + $0x198] sm:$0xff]  ;;  %v4157_v3 = vld [vmem:[%s4477_s28 + $0x190] sm:$0xff] }
  0x28   : > { %2496 = vmatpush.bf16.msra.mxu3 %v4134_v20  ;;  %v4166_v0 = vld [vmem:[%s4477_s28 + $0x1d8] sm:$0xff]  ;;  %v4165_v4 = vld [vmem:[%s4477_s28 + $0x1d0] sm:$0xff]  ;;  %v4140_v5 = vld [vmem:[%s4477_s28 + $0x108] sm:$0xff] }
  0x29   : > { %2458 = vmatpush.bf16.msra.mxu0 %v4109_v21  ;;  %v4148_v6 = vld [vmem:[%s4477_s28 + $0x148] sm:$0xff]  ;;  %v4139_v13 = vld [vmem:[%s4477_s28 + $0x100] sm:$0xff]  ;;  %v4178_v19 = vld [vmem:[%s4477_s28 + $0x238] sm:$0xff] }
  0x2a   : > { %2471 = vmatpush.bf16.msra.mxu1 %v4117_v22  ;;  %v4156_v8 = vld [vmem:[%s4477_s28 + $0x188] sm:$0xff]  ;;  %v4147_v14 = vld [vmem:[%s4477_s28 + $0x140] sm:$0xff]  ;;  %v4186_v20 = vld [vmem:[%s4477_s28 + $0x278] sm:$0xff] }
  0x2b   : > { %2484 = vmatpush.bf16.msra.mxu2 %v4125_v24  ;;  %v4164_v9 = vld [vmem:[%s4477_s28 + $0x1c8] sm:$0xff]  ;;  %v4155_v16 = vld [vmem:[%s4477_s28 + $0x180] sm:$0xff]  ;;  %v4194_v22 = vld [vmem:[%s4477_s28 + $0x2b8] sm:$0xff] }
  0x2c   : > { %2497 = vmatpush.bf16.msra.mxu3 %v4133_v25  ;;  %v4163_v17 = vld [vmem:[%s4477_s28 + $0x1c0] sm:$0xff]  ;;  %v4202_v23 = vld [vmem:[%s4477_s28 + $0x2f8] sm:$0xff]  ;;  %vm4049_vm12 = vmpackc.low %vm4597_vm9, %vm4597_vm9 }
  0x2d   : > { %2459 = vmatpush.bf16.msra.mxu0 %v4108_v27  ;;  %vm4045_vm14 = vmpackc.low %vm4604_vm10, %vm4604_vm10  ;;  %v4177_v25 = vld [vmem:[%s4477_s28 + $0x230] sm:$0xff]  ;;  %v4176_v30 = vld [vmem:[%s4477_s28 + $0x228] sm:$0xff] }
  0x2e   : > { %2472 = vmatpush.bf16.msra.mxu1 %v4116_v28  ;;  %vm4051_vm15 = vmpackc.low %vm4611_vm11, %vm4611_vm11  ;;  %v4185_v26 = vld [vmem:[%s4477_s28 + $0x270] sm:$0xff]  ;;  %v4200_v33 = vld [vmem:[%s4477_s28 + $0x2e8] sm:$0xff] }
  0x2f   : > { %2485 = vmatpush.bf16.msra.mxu2 %v4124_v31  ;;  %vm4047_vm0 = vmpackc.low %vm4621_vm13, %vm4621_vm13  ;;  %v4193_v27 = vld [vmem:[%s4477_s28 + $0x2b0] sm:$0xff]  ;;  %v4184_v31 = vld [vmem:[%s4477_s28 + $0x268] sm:$0xff] }
  0x30   : > { %2498 = vmatpush.bf16.msra.mxu3 %v4132_v32  ;;  %v4201_v28 = vld [vmem:[%s4477_s28 + $0x2f0] sm:$0xff]  ;;  %v4192_v32 = vld [vmem:[%s4477_s28 + $0x2a8] sm:$0xff]  ;;  %v4175_v34 = vld [vmem:[%s4477_s28 + $0x220] sm:$0xff] }
  0x31   : > { %2460 = vmatpush.bf16.msra.mxu0 %v4107_v36  ;;  %v4183_v35 = vld [vmem:[%s4477_s28 + $0x260] sm:$0xff]  ;;  %v4174_v38 = vld [vmem:[%s4477_s28 + $0x218] sm:$0xff]  ;;  %v4189_v44 = vld [vmem:[%s4477_s28 + $0x290] sm:$0xff] }
  0x32   : > { %2473 = vmatpush.bf16.msra.mxu1 %v4115_v37  ;;  %v4191_v36 = vld [vmem:[%s4477_s28 + $0x2a0] sm:$0xff]  ;;  %v4198_v41 = vld [vmem:[%s4477_s28 + $0x2d8] sm:$0xff]  ;;  %v4172_v47 = vld [vmem:[%s4477_s28 + $0x208] sm:$0xff] }
  0x33   : > { %2486 = vmatpush.bf16.msra.mxu2 %v4123_v39  ;;  %v4199_v37 = vld [vmem:[%s4477_s28 + $0x2e0] sm:$0xff]  ;;  %v4182_v39 = vld [vmem:[%s4477_s28 + $0x258] sm:$0xff]  ;;  %v4233_v7 = vld [vmem:[%s4477_s28 + $0x3f0] sm:$0xff] }
  0x34   : > { %2499 = vmatpush.bf16.msra.mxu3 %v4131_v40  ;;  %4038 = vmatmul.msk.bf16.vlgmr.msra.gmra.mxu0 %vm4037_vm6, %v4424_v52  ;;  %v4190_v40 = vld [vmem:[%s4477_s28 + $0x298] sm:$0xff]  ;;  %v4224_v10 = vld [vmem:[%s4477_s28 + $0x3a8] sm:$0xff]  ;;  %v4207_v12 = vld [vmem:[%s4477_s28 + $0x320] sm:$0xff] }
  0x35   : > { %2505 = vmatpush.bf16.msrb.mxu0 %v4146_v42  ;;  %4040 = vmatmul.msk.bf16.vlgmr.msra.gmra.mxu1 %vm4039_vm8, %v4424_v52  ;;  %v4173_v42 = vld [vmem:[%s4477_s28 + $0x210] sm:$0xff]  ;;  %v4232_v11 = vld [vmem:[%s4477_s28 + $0x3e8] sm:$0xff]  ;;  %v4231_v15 = vld [vmem:[%s4477_s28 + $0x3e0] sm:$0xff] }
  0x36   : > { %2518 = vmatpush.bf16.msrb.mxu1 %v4154_v43  ;;  %4042 = vmatmul.msk.bf16.vlgmr.msra.gmra.mxu2 %vm4041_vm4, %v4424_v52  ;;  %v4181_v43 = vld [vmem:[%s4477_s28 + $0x250] sm:$0xff]  ;;  %v4222_v18 = vld [vmem:[%s4477_s28 + $0x398] sm:$0xff]  ;;  %v4204_v24 = vld [vmem:[%s4477_s28 + $0x308] sm:$0xff] }
  0x37   : > { %2531 = vmatpush.bf16.msrb.mxu2 %v4162_v45  ;;  %4044 = vmatmul.msk.bf16.vlgmr.msra.gmra.mxu3 %vm4043_vm7, %v4424_v52  ;;  %v4197_v45 = vld [vmem:[%s4477_s28 + $0x2d0] sm:$0xff] }
  0x38   : > { %2544 = vmatpush.bf16.msrb.mxu3 %v4170_v46  ;;  %v4664_v46 = vld [vmem:[%s4472_s24 + $0x8] sm:$0xff]  ;;  %v4213_v21 = vld [vmem:[%s4477_s28 + $0x350] sm:$0xff] }
  0x39   : > { %2506 = vmatpush.bf16.msrb.mxu0 %v4145_v48  ;;  %v4180_v48 = vld [vmem:[%s4477_s28 + $0x248] sm:$0xff] }
  0x3a   : > { %2519 = vmatpush.bf16.msrb.mxu1 %v4153_v49  ;;  %v252_v49 = vperm.slane %v4664_v46, 0 }
  0x3b   : > { %2532 = vmatpush.bf16.msrb.mxu2 %v4161_v50  ;;  %v4188_v50 = vld [vmem:[%s4477_s28 + $0x288] sm:$0xff] }
  0x3c   : > { %2545 = vmatpush.bf16.msrb.mxu3 %v4169_v51  ;;  %v4196_v51 = vld [vmem:[%s4477_s28 + $0x2c8] sm:$0xff]  ;;  %vm4677_vm1 = vcmp.eq.s32.totalorder %v252_v49, %v4509_v29 }
  0x3d   : > { %2507 = vmatpush.bf16.msrb.mxu0 %v4144_v53  ;;  %v254_v53 = vperm.slane %v4664_v46, 2  ;;  %vm4053_vm4 = vmpackc.low %vm4677_vm1, %vm4677_vm1  ;;  %v4240_v49 = vld [vmem:[%s4477_s28 + $0x428] sm:$0xff] }
  0x3e   : > { %2520 = vmatpush.bf16.msrb.mxu1 %v4152_v54  ;;  %v253_v54 = vperm.slane %v4664_v46, 1 }
  0x3f   : > { %2533 = vmatpush.bf16.msrb.mxu2 %v4160_v55  ;;  %v255_v55 = vperm.slane %v4664_v46, 3  ;;  %vm4684_vm2 = vcmp.eq.s32.totalorder %v254_v53, %v4509_v29  ;;  %v4264_v53 = vld [vmem:[%s4477_s28 + $0x4e8] sm:$0xff] }
  0x40   : > { %2546 = vmatpush.bf16.msrb.mxu3 %v4168_v56  ;;  %v4171_v56 = vld [vmem:[%s4477_s28 + $0x200] sm:$0xff]  ;;  %vm4691_vm3 = vcmp.eq.s32.totalorder %v253_v54, %v4509_v29  ;;  %vm4057_vm6 = vmpackc.low %vm4684_vm2, %vm4684_vm2 }
  0x41   : > { %2508 = vmatpush.bf16.msrb.mxu0 %v4143_v57  ;;  %v4179_v57 = vld [vmem:[%s4477_s28 + $0x240] sm:$0xff]  ;;  %vm4701_vm5 = vcmp.eq.s32.totalorder %v255_v55, %v4509_v29  ;;  %vm4055_vm7 = vmpackc.low %vm4691_vm3, %vm4691_vm3 }
  0x42   : > { %2521 = vmatpush.bf16.msrb.mxu1 %v4151_v58  ;;  %vm4059_vm8 = vmpackc.low %vm4701_vm5, %vm4701_vm5  ;;  %v4239_v54 = vld [vmem:[%s4477_s28 + $0x420] sm:$0xff]  ;;  %v4238_v58 = vld [vmem:[%s4477_s28 + $0x418] sm:$0xff] }
  0x43   : > { %2534 = vmatpush.bf16.msrb.mxu2 %v4159_v59  ;;  %v4187_v59 = vld [vmem:[%s4477_s28 + $0x280] sm:$0xff] }
  0x44   : > { %2547 = vmatpush.bf16.msrb.mxu3 %v4167_v60  ;;  %v4195_v60 = vld [vmem:[%s4477_s28 + $0x2c0] sm:$0xff] }
  0x45   : > { %2509 = vmatpush.bf16.msrb.mxu0 %v4142_v61  ;;  %v4247_v55 = vld [vmem:[%s4477_s28 + $0x460] sm:$0xff]  ;;  %v4262_v61 = vld [vmem:[%s4477_s28 + $0x4d8] sm:$0xff] }
  0x46   : > { %2522 = vmatpush.bf16.msrb.mxu1 %v4150_v62  ;;  %v4210_v62 = vld [vmem:[%s4477_s28 + $0x338] sm:$0xff] }
  0x47   : > { %2535 = vmatpush.bf16.msrb.mxu2 %v4158_v63  ;;  %v4218_v63 = vld [vmem:[%s4477_s28 + $0x378] sm:$0xff] }
  0x48   : > { %2548 = vmatpush.bf16.msrb.mxu3 %v4166_v0  ;;  %v4253_v0 = vld [vmem:[%s4477_s28 + $0x490] sm:$0xff] }
  0x49   : > { %2510 = vmatpush.bf16.msrb.mxu0 %v4141_v1  ;;  %v4226_v1 = vld [vmem:[%s4477_s28 + $0x3b8] sm:$0xff] }
  0x4a   : > { %2523 = vmatpush.bf16.msrb.mxu1 %v4149_v2  ;;  %v4234_v2 = vld [vmem:[%s4477_s28 + $0x3f8] sm:$0xff] }
  0x4b   : > { %2536 = vmatpush.bf16.msrb.mxu2 %v4157_v3  ;;  %v4236_v3 = vld [vmem:[%s4477_s28 + $0x408] sm:$0xff] }
  0x4c   : > { %2549 = vmatpush.bf16.msrb.mxu3 %v4165_v4  ;;  %v4209_v4 = vld [vmem:[%s4477_s28 + $0x330] sm:$0xff] }
  0x4d   : > { %2511 = vmatpush.bf16.msrb.mxu0 %v4140_v5  ;;  %v4217_v5 = vld [vmem:[%s4477_s28 + $0x370] sm:$0xff] }
  0x4e   : > { %2524 = vmatpush.bf16.msrb.mxu1 %v4148_v6  ;;  %v4225_v6 = vld [vmem:[%s4477_s28 + $0x3b0] sm:$0xff] }
  0x4f   : > { %2537 = vmatpush.bf16.msrb.mxu2 %v4156_v8  ;;  %v4208_v8 = vld [vmem:[%s4477_s28 + $0x328] sm:$0xff] }
  0x50   : > { %2550 = vmatpush.bf16.msrb.mxu3 %v4164_v9  ;;  %v4216_v9 = vld [vmem:[%s4477_s28 + $0x368] sm:$0xff] }
  0x51   : > { %2512 = vmatpush.bf16.msrb.mxu0 %v4139_v13  ;;  %v4215_v13 = vld [vmem:[%s4477_s28 + $0x360] sm:$0xff] }
  0x52   : > { %2525 = vmatpush.bf16.msrb.mxu1 %v4147_v14  ;;  %v4223_v14 = vld [vmem:[%s4477_s28 + $0x3a0] sm:$0xff] }
  0x53   : > { %2538 = vmatpush.bf16.msrb.mxu2 %v4155_v16  ;;  %v4206_v16 = vld [vmem:[%s4477_s28 + $0x318] sm:$0xff] }
  0x54   : > { %2551 = vmatpush.bf16.msrb.mxu3 %v4163_v17  ;;  %4046 = vmatmul.msk.bf16.vlgmr.msrb.gmra.mxu0 %vm4045_vm14, %v4424_v52  ;;  %v4214_v17 = vld [vmem:[%s4477_s28 + $0x358] sm:$0xff] }
  0x55   : > { %2557 = vmatpush.bf16.msra.mxu0 %v4178_v19  ;;  %4048 = vmatmul.msk.bf16.vlgmr.msrb.gmra.mxu1 %vm4047_vm0, %v4424_v52  ;;  %v4230_v19 = vld [vmem:[%s4477_s28 + $0x3d8] sm:$0xff] }
  0x56   : > { %2570 = vmatpush.bf16.msra.mxu1 %v4186_v20  ;;  %4050 = vmatmul.msk.bf16.vlgmr.msrb.gmra.mxu2 %vm4049_vm12, %v4424_v52  ;;  %v4205_v20 = vld [vmem:[%s4477_s28 + $0x310] sm:$0xff] }
  0x57   : > { %2583 = vmatpush.bf16.msra.mxu2 %v4194_v22  ;;  %4052 = vmatmul.msk.bf16.vlgmr.msrb.gmra.mxu3 %vm4051_vm15, %v4424_v52  ;;  %v4221_v22 = vld [vmem:[%s4477_s28 + $0x390] sm:$0xff] }
  0x58   : > { %2596 = vmatpush.bf16.msra.mxu3 %v4202_v23  ;;  %v4229_v23 = vld [vmem:[%s4477_s28 + $0x3d0] sm:$0xff] }
  0x59   : > { %2558 = vmatpush.bf16.msra.mxu0 %v4177_v25  ;;  %v4212_v25 = vld [vmem:[%s4477_s28 + $0x348] sm:$0xff] }
  0x5a   : > { %2571 = vmatpush.bf16.msra.mxu1 %v4185_v26  ;;  %v256_v26 = vperm.slane %v4664_v46, 4 }
  0x5b   : > { %2584 = vmatpush.bf16.msra.mxu2 %v4193_v27  ;;  %v4220_v27 = vld [vmem:[%s4477_s28 + $0x388] sm:$0xff] }
  0x5c   : > { %2597 = vmatpush.bf16.msra.mxu3 %v4201_v28  ;;  %v4228_v28 = vld [vmem:[%s4477_s28 + $0x3c8] sm:$0xff]  ;;  %vm4754_vm9 = vcmp.eq.s32.totalorder %v256_v26, %v4509_v29  ;;  %v4297_v26 = vld [vmem:[%s4477_s28 + $0x5f0] sm:$0xff] }
  0x5d   : > { %2559 = vmatpush.bf16.msra.mxu0 %v4176_v30  ;;  %v258_v30 = vperm.slane %v4664_v46, 6  ;;  %vm4061_vm12 = vmpackc.low %vm4754_vm9, %vm4754_vm9 }
  0x5e   : > { %2572 = vmatpush.bf16.msra.mxu1 %v4184_v31  ;;  %v257_v31 = vperm.slane %v4664_v46, 5 }
  0x5f   : > { %2585 = vmatpush.bf16.msra.mxu2 %v4192_v32  ;;  %v259_v32 = vperm.slane %v4664_v46, 7  ;;  %vm4761_vm10 = vcmp.eq.s32.totalorder %v258_v30, %v4509_v29  ;;  %v4249_v46 = vld [vmem:[%s4477_s28 + $0x470] sm:$0xff]  ;;  %v4288_v30 = vld [vmem:[%s4477_s28 + $0x5a8] sm:$0xff] }
  0x60   : > { %2598 = vmatpush.bf16.msra.mxu3 %v4200_v33  ;;  %v4203_v33 = vld [vmem:[%s4477_s28 + $0x300] sm:$0xff]  ;;  %vm4768_vm11 = vcmp.eq.s32.totalorder %v257_v31, %v4509_v29  ;;  %vm4065_vm14 = vmpackc.low %vm4761_vm10, %vm4761_vm10  ;;  %v4296_v31 = vld [vmem:[%s4477_s28 + $0x5e8] sm:$0xff] }
  0x61   : > { %2560 = vmatpush.bf16.msra.mxu0 %v4175_v34  ;;  %v4211_v34 = vld [vmem:[%s4477_s28 + $0x340] sm:$0xff]  ;;  %vm4778_vm13 = vcmp.eq.s32.totalorder %v259_v32, %v4509_v29  ;;  %vm4063_vm15 = vmpackc.low %vm4768_vm11, %vm4768_vm11 }
  0x62   : > { %2573 = vmatpush.bf16.msra.mxu1 %v4183_v35  ;;  %vm4067_vm0 = vmpackc.low %vm4778_vm13, %vm4778_vm13 }
  0x63   : > { %2586 = vmatpush.bf16.msra.mxu2 %v4191_v36  ;;  %v4219_v36 = vld [vmem:[%s4477_s28 + $0x380] sm:$0xff] }
  0x64   : > { %2599 = vmatpush.bf16.msra.mxu3 %v4199_v37  ;;  %v4227_v37 = vld [vmem:[%s4477_s28 + $0x3c0] sm:$0xff] }
  0x65   : > { %2561 = vmatpush.bf16.msra.mxu0 %v4174_v38 }
  0x66   : > { %2574 = vmatpush.bf16.msra.mxu1 %v4182_v39  ;;  %v4242_v39 = vld [vmem:[%s4477_s28 + $0x438] sm:$0xff] }
  0x67   : > { %2587 = vmatpush.bf16.msra.mxu2 %v4190_v40  ;;  %v4250_v40 = vld [vmem:[%s4477_s28 + $0x478] sm:$0xff] }
  0x68   : > { %2600 = vmatpush.bf16.msra.mxu3 %v4198_v41  ;;  %v4286_v41 = vld [vmem:[%s4477_s28 + $0x598] sm:$0xff] }
  0x69   : > { %2562 = vmatpush.bf16.msra.mxu0 %v4173_v42  ;;  %v4258_v42 = vld [vmem:[%s4477_s28 + $0x4b8] sm:$0xff] }
  0x6a   : > { %2575 = vmatpush.bf16.msra.mxu1 %v4181_v43  ;;  %v4266_v43 = vld [vmem:[%s4477_s28 + $0x4f8] sm:$0xff] }
  0x6b   : > { %2588 = vmatpush.bf16.msra.mxu2 %v4189_v44 }
  0x6c   : > { %2601 = vmatpush.bf16.msra.mxu3 %v4197_v45  ;;  %v4241_v45 = vld [vmem:[%s4477_s28 + $0x430] sm:$0xff] }
  0x6d   : > { %2563 = vmatpush.bf16.msra.mxu0 %v4172_v47  ;;  %v4257_v47 = vld [vmem:[%s4477_s28 + $0x4b0] sm:$0xff] }
  0x6e   : > { %2576 = vmatpush.bf16.msra.mxu1 %v4180_v48  ;;  %v4265_v48 = vld [vmem:[%s4477_s28 + $0x4f0] sm:$0xff] }
  0x6f   : > { %2589 = vmatpush.bf16.msra.mxu2 %v4188_v50  ;;  %v4248_v50 = vld [vmem:[%s4477_s28 + $0x468] sm:$0xff] }
  0x70   : > { %2602 = vmatpush.bf16.msra.mxu3 %v4196_v51  ;;  %v4256_v51 = vld [vmem:[%s4477_s28 + $0x4a8] sm:$0xff] }
  0x71   : > { %2564 = vmatpush.bf16.msra.mxu0 %v4171_v56  ;;  %v4255_v56 = vld [vmem:[%s4477_s28 + $0x4a0] sm:$0xff] }
  0x72   : > { %2577 = vmatpush.bf16.msra.mxu1 %v4179_v57  ;;  %v4263_v57 = vld [vmem:[%s4477_s28 + $0x4e0] sm:$0xff] }
  0x73   : > { %2590 = vmatpush.bf16.msra.mxu2 %v4187_v59  ;;  %v4246_v59 = vld [vmem:[%s4477_s28 + $0x458] sm:$0xff] }
  0x74   : > { %2603 = vmatpush.bf16.msra.mxu3 %v4195_v60  ;;  %4054 = vmatmul.msk.bf16.vlgmr.msra.gmra.mxu0 %vm4053_vm4, %v4424_v52  ;;  %v4254_v60 = vld [vmem:[%s4477_s28 + $0x498] sm:$0xff] }
  0x75   : > { %2609 = vmatpush.bf16.msrb.mxu0 %v4210_v62  ;;  %4056 = vmatmul.msk.bf16.vlgmr.msra.gmra.mxu1 %vm4055_vm7, %v4424_v52  ;;  %v4237_v62 = vld [vmem:[%s4477_s28 + $0x410] sm:$0xff] }
  0x76   : > { %2622 = vmatpush.bf16.msrb.mxu1 %v4218_v63  ;;  %4058 = vmatmul.msk.bf16.vlgmr.msra.gmra.mxu2 %vm4057_vm6, %v4424_v52  ;;  %v4245_v63 = vld [vmem:[%s4477_s28 + $0x450] sm:$0xff] }
  0x77   : > { %2635 = vmatpush.bf16.msrb.mxu2 %v4226_v1  ;;  %4060 = vmatmul.msk.bf16.vlgmr.msra.gmra.mxu3 %vm4059_vm8, %v4424_v52  ;;  %v4261_v1 = vld [vmem:[%s4477_s28 + $0x4d0] sm:$0xff] }
  0x78   : > { %2648 = vmatpush.bf16.msrb.mxu3 %v4234_v2  ;;  %v4821_v2 = vld [vmem:[%s4472_s24 + $0x10] sm:$0xff] }
  0x79   : > { %2610 = vmatpush.bf16.msrb.mxu0 %v4209_v4  ;;  %v4244_v4 = vld [vmem:[%s4477_s28 + $0x448] sm:$0xff] }
  0x7a   : > { %2623 = vmatpush.bf16.msrb.mxu1 %v4217_v5  ;;  %v260_v5 = vperm.slane %v4821_v2, 0 }
  0x7b   : > { %2636 = vmatpush.bf16.msrb.mxu2 %v4225_v6  ;;  %v4252_v6 = vld [vmem:[%s4477_s28 + $0x488] sm:$0xff] }
  0x7c   : > { %2649 = vmatpush.bf16.msrb.mxu3 %v4233_v7  ;;  %v4260_v7 = vld [vmem:[%s4477_s28 + $0x4c8] sm:$0xff]  ;;  %vm4834_vm1 = vcmp.eq.s32.totalorder %v260_v5, %v4509_v29  ;;  %v4291_v5 = vld [vmem:[%s4477_s28 + $0x5c0] sm:$0xff] }
  0x7d   : > { %2611 = vmatpush.bf16.msrb.mxu0 %v4208_v8  ;;  %v262_v8 = vperm.slane %v4821_v2, 2  ;;  %vm4069_vm4 = vmpackc.low %vm4834_vm1, %vm4834_vm1 }
  0x7e   : > { %2624 = vmatpush.bf16.msrb.mxu1 %v4216_v9  ;;  %v261_v9 = vperm.slane %v4821_v2, 1 }
  0x7f   : > { %2637 = vmatpush.bf16.msrb.mxu2 %v4224_v10  ;;  %v263_v10 = vperm.slane %v4821_v2, 3  ;;  %vm4841_vm2 = vcmp.eq.s32.totalorder %v262_v8, %v4509_v29  ;;  %v4344_v8 = vld [vmem:[%s4477_s28 + $0x768] sm:$0xff] }
  0x80   : > { %2650 = vmatpush.bf16.msrb.mxu3 %v4232_v11  ;;  %v4235_v11 = vld [vmem:[%s4477_s28 + $0x400] sm:$0xff]  ;;  %vm4848_vm3 = vcmp.eq.s32.totalorder %v261_v9, %v4509_v29  ;;  %vm4073_vm6 = vmpackc.low %vm4841_vm2, %vm4841_vm2  ;;  %v4322_v9 = vld [vmem:[%s4477_s28 + $0x6b8] sm:$0xff] }
  0x81   : > { %2612 = vmatpush.bf16.msrb.mxu0 %v4207_v12  ;;  %v4243_v12 = vld [vmem:[%s4477_s28 + $0x440] sm:$0xff]  ;;  %vm4858_vm5 = vcmp.eq.s32.totalorder %v263_v10, %v4509_v29  ;;  %vm4071_vm7 = vmpackc.low %vm4848_vm3, %vm4848_vm3  ;;  %v4330_v10 = vld [vmem:[%s4477_s28 + $0x6f8] sm:$0xff] }
  0x82   : > { %2625 = vmatpush.bf16.msrb.mxu1 %v4215_v13  ;;  %vm4075_vm8 = vmpackc.low %vm4858_vm5, %vm4858_vm5  ;;  %v4313_v13 = vld [vmem:[%s4477_s28 + $0x670] sm:$0xff] }
  0x83   : > { %2638 = vmatpush.bf16.msrb.mxu2 %v4223_v14  ;;  %v4251_v14 = vld [vmem:[%s4477_s28 + $0x480] sm:$0xff] }
  0x84   : > { %2651 = vmatpush.bf16.msrb.mxu3 %v4231_v15  ;;  %v4259_v15 = vld [vmem:[%s4477_s28 + $0x4c0] sm:$0xff] }
  0x85   : > { %2613 = vmatpush.bf16.msrb.mxu0 %v4206_v16  ;;  %v4304_v16 = vld [vmem:[%s4477_s28 + $0x628] sm:$0xff] }
  0x86   : > { %2626 = vmatpush.bf16.msrb.mxu1 %v4214_v17  ;;  %v4274_v17 = vld [vmem:[%s4477_s28 + $0x538] sm:$0xff] }
  0x87   : > { %2639 = vmatpush.bf16.msrb.mxu2 %v4222_v18  ;;  %v4282_v18 = vld [vmem:[%s4477_s28 + $0x578] sm:$0xff] }
  0x88   : > { %2652 = vmatpush.bf16.msrb.mxu3 %v4230_v19  ;;  %v4328_v19 = vld [vmem:[%s4477_s28 + $0x6e8] sm:$0xff] }
  0x89   : > { %2614 = vmatpush.bf16.msrb.mxu0 %v4205_v20  ;;  %v4290_v20 = vld [vmem:[%s4477_s28 + $0x5b8] sm:$0xff] }
  0x8a   : > { %2627 = vmatpush.bf16.msrb.mxu1 %v4213_v21  ;;  %v4298_v21 = vld [vmem:[%s4477_s28 + $0x5f8] sm:$0xff] }
  0x8b   : > { %2640 = vmatpush.bf16.msrb.mxu2 %v4221_v22  ;;  %v4311_v22 = vld [vmem:[%s4477_s28 + $0x660] sm:$0xff] }
  0x8c   : > { %2653 = vmatpush.bf16.msrb.mxu3 %v4229_v23  ;;  %v4273_v23 = vld [vmem:[%s4477_s28 + $0x530] sm:$0xff] }
  0x8d   : > { %2615 = vmatpush.bf16.msrb.mxu0 %v4204_v24  ;;  %v4281_v24 = vld [vmem:[%s4477_s28 + $0x570] sm:$0xff] }
  0x8e   : > { %2628 = vmatpush.bf16.msrb.mxu1 %v4212_v25  ;;  %v4289_v25 = vld [vmem:[%s4477_s28 + $0x5b0] sm:$0xff] }
  0x8f   : > { %2641 = vmatpush.bf16.msrb.mxu2 %v4220_v27  ;;  %v4272_v27 = vld [vmem:[%s4477_s28 + $0x528] sm:$0xff] }
  0x90   : > { %2654 = vmatpush.bf16.msrb.mxu3 %v4228_v28  ;;  %v4280_v28 = vld [vmem:[%s4477_s28 + $0x568] sm:$0xff] }
  0x91   : > { %2616 = vmatpush.bf16.msrb.mxu0 %v4203_v33  ;;  %v4271_v33 = vld [vmem:[%s4477_s28 + $0x520] sm:$0xff] }
  0x92   : > { %2629 = vmatpush.bf16.msrb.mxu1 %v4211_v34  ;;  %v4279_v34 = vld [vmem:[%s4477_s28 + $0x560] sm:$0xff] }
  0x93   : > { %2642 = vmatpush.bf16.msrb.mxu2 %v4219_v36  ;;  %v4287_v36 = vld [vmem:[%s4477_s28 + $0x5a0] sm:$0xff] }
  0x94   : > { %2655 = vmatpush.bf16.msrb.mxu3 %v4227_v37  ;;  %4062 = vmatmul.msk.bf16.vlgmr.msrb.gmra.mxu0 %vm4061_vm12, %v4424_v52  ;;  %v4295_v37 = vld [vmem:[%s4477_s28 + $0x5e0] sm:$0xff] }
  0x95   : > { %2661 = vmatpush.bf16.msra.mxu0 %v4242_v39  ;;  %4064 = vmatmul.msk.bf16.vlgmr.msrb.gmra.mxu1 %vm4063_vm15, %v4424_v52  ;;  %v4270_v39 = vld [vmem:[%s4477_s28 + $0x518] sm:$0xff] }
  0x96   : > { %2674 = vmatpush.bf16.msra.mxu1 %v4250_v40  ;;  %4066 = vmatmul.msk.bf16.vlgmr.msrb.gmra.mxu2 %vm4065_vm14, %v4424_v52  ;;  %v4278_v40 = vld [vmem:[%s4477_s28 + $0x558] sm:$0xff] }
  0x97   : > { %2687 = vmatpush.bf16.msra.mxu2 %v4258_v42  ;;  %4068 = vmatmul.msk.bf16.vlgmr.msrb.gmra.mxu3 %vm4067_vm0, %v4424_v52  ;;  %v4294_v42 = vld [vmem:[%s4477_s28 + $0x5d8] sm:$0xff] }
  0x98   : > { %2700 = vmatpush.bf16.msra.mxu3 %v4266_v43 }
  0x99   : > { %2662 = vmatpush.bf16.msra.mxu0 %v4241_v45 }
  0x9a   : > { %2675 = vmatpush.bf16.msra.mxu1 %v4249_v46 }
  0x9b   : > { %2688 = vmatpush.bf16.msra.mxu2 %v4257_v47  ;;  %v4269_v47 = vld [vmem:[%s4477_s28 + $0x510] sm:$0xff] }
  0x9c   : > { %2701 = vmatpush.bf16.msra.mxu3 %v4265_v48  ;;  %v4277_v48 = vld [vmem:[%s4477_s28 + $0x550] sm:$0xff] }
  0x9d   : > { %2663 = vmatpush.bf16.msra.mxu0 %v4240_v49 }
  0x9e   : > { %2676 = vmatpush.bf16.msra.mxu1 %v4248_v50 }
  0x9f   : > { %2689 = vmatpush.bf16.msra.mxu2 %v4256_v51  ;;  %v4285_v51 = vld [vmem:[%s4477_s28 + $0x590] sm:$0xff] }
  0xa0   : > { %2702 = vmatpush.bf16.msra.mxu3 %v4264_v53  ;;  %v4293_v53 = vld [vmem:[%s4477_s28 + $0x5d0] sm:$0xff] }
  0xa1   : > { %2664 = vmatpush.bf16.msra.mxu0 %v4239_v54  ;;  %v4268_v54 = vld [vmem:[%s4477_s28 + $0x508] sm:$0xff] }
  0xa2   : > { %2677 = vmatpush.bf16.msra.mxu1 %v4247_v55  ;;  %v4276_v55 = vld [vmem:[%s4477_s28 + $0x548] sm:$0xff] }
  0xa3   : > { %2690 = vmatpush.bf16.msra.mxu2 %v4255_v56  ;;  %v264_v56 = vperm.slane %v4821_v2, 4 }
  0xa4   : > { %2703 = vmatpush.bf16.msra.mxu3 %v4263_v57  ;;  %v4284_v57 = vld [vmem:[%s4477_s28 + $0x588] sm:$0xff] }
  0xa5   : > { %2665 = vmatpush.bf16.msra.mxu0 %v4238_v58  ;;  %v4292_v58 = vld [vmem:[%s4477_s28 + $0x5c8] sm:$0xff]  ;;  %vm4913_vm9 = vcmp.eq.s32.totalorder %v264_v56, %v4509_v29  ;;  %v4307_v56 = vld [vmem:[%s4477_s28 + $0x640] sm:$0xff] }
  0xa6   : > { %2678 = vmatpush.bf16.msra.mxu1 %v4246_v59  ;;  %v266_v59 = vperm.slane %v4821_v2, 6  ;;  %vm4077_vm12 = vmpackc.low %vm4913_vm9, %vm4913_vm9 }
  0xa7   : > { %2691 = vmatpush.bf16.msra.mxu2 %v4254_v60 }
  0xa8   : > { %2704 = vmatpush.bf16.msra.mxu3 %v4262_v61  ;;  %v265_v61 = vperm.slane %v4821_v2, 5  ;;  %vm4920_vm10 = vcmp.eq.s32.totalorder %v266_v59, %v4509_v29  ;;  %v4323_v59 = vld [vmem:[%s4477_s28 + $0x6c0] sm:$0xff] }
  0xa9   : > { %2666 = vmatpush.bf16.msra.mxu0 %v4237_v62  ;;  %vm4081_vm14 = vmpackc.low %vm4920_vm10, %vm4920_vm10 }
  0xaa   : > { %2679 = vmatpush.bf16.msra.mxu1 %v4245_v63  ;;  %v267_v63 = vperm.slane %v4821_v2, 7  ;;  %v4314_v2 = vld [vmem:[%s4477_s28 + $0x678] sm:$0xff]  ;;  %vm4927_vm11 = vcmp.eq.s32.totalorder %v265_v61, %v4509_v29 }
  0xab   : > { %2692 = vmatpush.bf16.msra.mxu2 %v4253_v0  ;;  %v4267_v0 = vld [vmem:[%s4477_s28 + $0x500] sm:$0xff]  ;;  %vm4079_vm15 = vmpackc.low %vm4927_vm11, %vm4927_vm11  ;;  %v4338_v61 = vld [vmem:[%s4477_s28 + $0x738] sm:$0xff] }
  0xac   : > { %2705 = vmatpush.bf16.msra.mxu3 %v4261_v1  ;;  %v4275_v1 = vld [vmem:[%s4477_s28 + $0x540] sm:$0xff]  ;;  %vm4937_vm13 = vcmp.eq.s32.totalorder %v267_v63, %v4509_v29 }
  0xad   : > { %2667 = vmatpush.bf16.msra.mxu0 %v4236_v3  ;;  %vm4083_vm0 = vmpackc.low %vm4937_vm13, %vm4937_vm13 }
  0xae   : > { %2680 = vmatpush.bf16.msra.mxu1 %v4244_v4  ;;  %v4283_v4 = vld [vmem:[%s4477_s28 + $0x580] sm:$0xff] }
  0xaf   : > { %2693 = vmatpush.bf16.msra.mxu2 %v4252_v6  ;;  %v4353_v6 = vld [vmem:[%s4477_s28 + $0x7b0] sm:$0xff] }
  0xb0   : > { %2706 = vmatpush.bf16.msra.mxu3 %v4260_v7  ;;  %v4306_v7 = vld [vmem:[%s4477_s28 + $0x638] sm:$0xff] }
  0xb1   : > { %2668 = vmatpush.bf16.msra.mxu0 %v4235_v11  ;;  %v2462_v32 = vpop.f32.mrf.mxu0 }
  0xb2   : > { %2681 = vmatpush.bf16.msra.mxu1 %v4243_v12  ;;  %v2475_v35 = vpop.f32.mrf.mxu1  ;;  %v4305_v12 = vld [vmem:[%s4477_s28 + $0x630] sm:$0xff] }
  0xb3   : > { %2694 = vmatpush.bf16.msra.mxu2 %v4251_v14  ;;  %v2476_v38 = vadd.f32 %v2475_v35, %v2462_v32  ;;  %v4321_v14 = vld [vmem:[%s4477_s28 + $0x6b0] sm:$0xff]  ;;  %v4326_v32 = vld [vmem:[%s4477_s28 + $0x6d8] sm:$0xff] }
  0xb4   : > { %2707 = vmatpush.bf16.msra.mxu3 %v4259_v15  ;;  %4070 = vmatmul.msk.bf16.vlgmr.msra.gmra.mxu0 %vm4069_vm4, %v4424_v52  ;;  %v4329_v15 = vld [vmem:[%s4477_s28 + $0x6f0] sm:$0xff] }
  0xb5   : > { %2713 = vmatpush.bf16.msrb.mxu0 %v4274_v17  ;;  %4072 = vmatmul.msk.bf16.vlgmr.msra.gmra.mxu1 %vm4071_vm7, %v4424_v52  ;;  %v4312_v17 = vld [vmem:[%s4477_s28 + $0x668] sm:$0xff] }
  0xb6   : > { %2726 = vmatpush.bf16.msrb.mxu1 %v4282_v18  ;;  %4074 = vmatmul.msk.bf16.vlgmr.msra.gmra.mxu2 %vm4073_vm6, %v4424_v52  ;;  %v4320_v18 = vld [vmem:[%s4477_s28 + $0x6a8] sm:$0xff] }
  0xb7   : > { %2739 = vmatpush.bf16.msrb.mxu2 %v4290_v20  ;;  %4076 = vmatmul.msk.bf16.vlgmr.msra.gmra.mxu3 %vm4075_vm8, %v4424_v52 }
  0xb8   : > { %2752 = vmatpush.bf16.msrb.mxu3 %v4298_v21  ;;  %v4303_v21 = vld [vmem:[%s4477_s28 + $0x620] sm:$0xff] }
  0xb9   : > { %2714 = vmatpush.bf16.msrb.mxu0 %v4273_v23  ;;  %v2488_v43 = vpop.f32.mrf.mxu2  ;;  %v2464_v46 = vpop.f32.mrf.mxu0 }
  0xba   : > { %2727 = vmatpush.bf16.msrb.mxu1 %v4281_v24  ;;  %v2489_v44 = vadd.f32 %v2488_v43, %v2476_v38  ;;  %v2501_v45 = vpop.f32.mrf.mxu3  ;;  %v2477_v50 = vpop.f32.mrf.mxu1  ;;  %v4309_v38 = vld [vmem:[%s4477_s28 + $0x650] sm:$0xff]  ;;  %v4983_v43 = vld [vmem:[%s4472_s24 + $0x18] sm:$0xff] }
  0xbb   : > { %2740 = vmatpush.bf16.msrb.mxu2 %v4289_v25  ;;  %v4319_v25 = vld [vmem:[%s4477_s28 + $0x6a0] sm:$0xff]  ;;  %v268_v46 = vperm.slane %v4983_v43, 0 }
  0xbc   : > { %2753 = vmatpush.bf16.msrb.mxu3 %v4297_v26  ;;  %v4898_v49 = vadd.f32 %v2501_v45, %v2489_v44  ;;  %v4327_v26 = vld [vmem:[%s4477_s28 + $0x6e0] sm:$0xff]  ;;  %v4300_v44 = vld [vmem:[%s4477_s28 + $0x608] sm:$0xff] }
  0xbd   : > { %2715 = vmatpush.bf16.msrb.mxu0 %v4272_v27  ;;  %v4308_v45 = vld [vmem:[%s4477_s28 + $0x648] sm:$0xff]  ;;  %vm4996_vm1 = vcmp.eq.s32.totalorder %v268_v46, %v4509_v29  ;;  %v4331_v46 = vld [vmem:[%s4477_s28 + $0x700] sm:$0xff] }
  0xbe   : > { %2728 = vmatpush.bf16.msrb.mxu1 %v4280_v28  ;;  %v4302_v28 = vld [vmem:[%s4477_s28 + $0x618] sm:$0xff]  ;;  %vm4085_vm4 = vmpackc.low %vm4996_vm1, %vm4996_vm1  ;;  %vm2870_vm1 = vcmask 261120  }
  0xbf   : > { %2741 = vmatpush.bf16.msrb.mxu2 %v4288_v30  ;;  %v4310_v30 = vld [vmem:[%s4477_s28 + $0x658] sm:$0xff] }
  0xc0   : > { %2754 = vmatpush.bf16.msrb.mxu3 %v4296_v31  ;;  %v4318_v31 = vld [vmem:[%s4477_s28 + $0x698] sm:$0xff] }
  0xc1   : > { %2716 = vmatpush.bf16.msrb.mxu0 %v4271_v33  ;;  %v2490_v60 = vpop.f32.mrf.mxu2 }
  0xc2   : > { %2729 = vmatpush.bf16.msrb.mxu1 %v4279_v34  ;;  %v2503_v62 = vpop.f32.mrf.mxu3 }
  0xc3   : > { %2742 = vmatpush.bf16.msrb.mxu2 %v4287_v36  ;;  %v4346_v62 = vld [vmem:[%s4477_s28 + $0x778] sm:$0xff] }
  0xc4   : > { %2755 = vmatpush.bf16.msrb.mxu3 %v4295_v37  ;;  %v4301_v37 = vld [vmem:[%s4477_s28 + $0x610] sm:$0xff] }
  0xc5   : > { %2717 = vmatpush.bf16.msrb.mxu0 %v4270_v39 }
  0xc6   : > { %2730 = vmatpush.bf16.msrb.mxu1 %v4278_v40 }
  0xc7   : > { %2743 = vmatpush.bf16.msrb.mxu2 %v4286_v41  ;;  %v4317_v41 = vld [vmem:[%s4477_s28 + $0x690] sm:$0xff] }
  0xc8   : > { %2756 = vmatpush.bf16.msrb.mxu3 %v4294_v42  ;;  %v4325_v42 = vld [vmem:[%s4477_s28 + $0x6d0] sm:$0xff] }
  0xc9   : > { %2718 = vmatpush.bf16.msrb.mxu0 %v4269_v47  ;;  %v4316_v47 = vld [vmem:[%s4477_s28 + $0x688] sm:$0xff] }
  0xca   : > { %2731 = vmatpush.bf16.msrb.mxu1 %v4277_v48  ;;  %v4324_v48 = vld [vmem:[%s4477_s28 + $0x6c8] sm:$0xff] }
  0xcb   : > { %2744 = vmatpush.bf16.msrb.mxu2 %v4285_v51  ;;  %v269_v51 = vperm.slane %v4983_v43, 1 }
  0xcc   : > { %2757 = vmatpush.bf16.msrb.mxu3 %v4293_v53 }
  0xcd   : > { %2719 = vmatpush.bf16.msrb.mxu0 %v4268_v54  ;;  %v271_v54 = vperm.slane %v4983_v43, 3  ;;  %vm5010_vm3 = vcmp.eq.s32.totalorder %v269_v51, %v4509_v29 }
  0xce   : > { %2732 = vmatpush.bf16.msrb.mxu1 %v4276_v55  ;;  %v4299_v55 = vld [vmem:[%s4477_s28 + $0x600] sm:$0xff]  ;;  %vm4087_vm7 = vmpackc.low %vm5010_vm3, %vm5010_vm3 }
  0xcf   : > { %2745 = vmatpush.bf16.msrb.mxu2 %v4284_v57  ;;  %vm5020_vm5 = vcmp.eq.s32.totalorder %v271_v54, %v4509_v29 }
  0xd0   : > { %2758 = vmatpush.bf16.msrb.mxu3 %v4292_v58  ;;  %v4315_v58 = vld [vmem:[%s4477_s28 + $0x680] sm:$0xff]  ;;  %vm4091_vm8 = vmpackc.low %vm5020_vm5, %vm5020_vm5 }
  0xd1   : > { %2720 = vmatpush.bf16.msrb.mxu0 %v4267_v0  ;;  %v2514_v20 = vpop.f32.mrf.mxu0  ;;  %v4354_v0 = vld [vmem:[%s4477_s28 + $0x7b8] sm:$0xff] }
  0xd2   : > { %2733 = vmatpush.bf16.msrb.mxu1 %v4275_v1  ;;  %v2515_v23 = vadd.f32 %v2514_v20, %v4898_v49  ;;  %v2527_v24 = vpop.f32.mrf.mxu1  ;;  %v270_v49 = vperm.slane %v4983_v43, 2  ;;  %v4362_v1 = vld [vmem:[%s4477_s28 + $0x7f8] sm:$0xff] }
  0xd3   : > { %2746 = vmatpush.bf16.msrb.mxu2 %v4283_v4  ;;  %v4337_v4 = vld [vmem:[%s4477_s28 + $0x730] sm:$0xff]  ;;  %v4342_v20 = vld [vmem:[%s4477_s28 + $0x758] sm:$0xff] }
  0xd4   : > { %2759 = vmatpush.bf16.msrb.mxu3 %v4291_v5  ;;  %4078 = vmatmul.msk.bf16.vlgmr.msrb.gmra.mxu0 %vm4077_vm12, %v4424_v52  ;;  %v2528_v27 = vadd.f32 %v2527_v24, %v2515_v23  ;;  %vm5003_vm2 = vcmp.eq.s32.totalorder %v270_v49, %v4509_v29  ;;  %v4345_v5 = vld [vmem:[%s4477_s28 + $0x770] sm:$0xff]  ;;  %v4347_v49 = vld [vmem:[%s4477_s28 + $0x780] sm:$0xff] }
  0xd5   : > { %2765 = vmatpush.bf16.msra.mxu0 %v4306_v7  ;;  %4080 = vmatmul.msk.bf16.vlgmr.msrb.gmra.mxu1 %vm4079_vm15, %v4424_v52  ;;  %vm4089_vm6 = vmpackc.low %vm5003_vm2, %vm5003_vm2  ;;  %v4361_v7 = vld [vmem:[%s4477_s28 + $0x7f0] sm:$0xff] }
  0xd6   : > { %2778 = vmatpush.bf16.msra.mxu1 %v4314_v2  ;;  %4082 = vmatmul.msk.bf16.vlgmr.msrb.gmra.mxu2 %vm4081_vm14, %v4424_v52  ;;  %v4336_v2 = vld [vmem:[%s4477_s28 + $0x728] sm:$0xff] }
  0xd7   : > { %2791 = vmatpush.bf16.msra.mxu2 %v4322_v9  ;;  %4084 = vmatmul.msk.bf16.vlgmr.msrb.gmra.mxu3 %vm4083_vm0, %v4424_v52  ;;  %v4352_v9 = vld [vmem:[%s4477_s28 + $0x7a8] sm:$0xff] }
  0xd8   : > { %2804 = vmatpush.bf16.msra.mxu3 %v4330_v10  ;;  %v4360_v10 = vld [vmem:[%s4477_s28 + $0x7e8] sm:$0xff] }
  0xd9   : > { %2766 = vmatpush.bf16.msra.mxu0 %v4305_v12  ;;  %v2540_v33 = vpop.f32.mrf.mxu2  ;;  %v2516_v36 = vpop.f32.mrf.mxu0 }
  0xda   : > { %2779 = vmatpush.bf16.msra.mxu1 %v4313_v13  ;;  %v2541_v34 = vadd.f32 %v2540_v33, %v2528_v27  ;;  %v2553_v35 = vpop.f32.mrf.mxu3  ;;  %v2529_v40 = vpop.f32.mrf.mxu1  ;;  %v4335_v13 = vld [vmem:[%s4477_s28 + $0x720] sm:$0xff]  ;;  %v4357_v33 = vld [vmem:[%s4477_s28 + $0x7d0] sm:$0xff]  ;;  %v4340_v36 = vld [vmem:[%s4477_s28 + $0x748] sm:$0xff] }
  0xdb   : > { %2792 = vmatpush.bf16.msra.mxu2 %v4321_v14  ;;  %v4343_v14 = vld [vmem:[%s4477_s28 + $0x760] sm:$0xff]  ;;  %v274_v40 = vperm.slane %v4983_v43, 6 }
  0xdc   : > { %2805 = vmatpush.bf16.msra.mxu3 %v4329_v15  ;;  %v4978_v39 = vadd.f32 %v2553_v35, %v2541_v34  ;;  %v272_v34 = vperm.slane %v4983_v43, 4  ;;  %v4332_v35 = vld [vmem:[%s4477_s28 + $0x708] sm:$0xff] }
  0xdd   : > { %2767 = vmatpush.bf16.msra.mxu0 %v4304_v16  ;;  %v4351_v16 = vld [vmem:[%s4477_s28 + $0x7a0] sm:$0xff]  ;;  %vm306_vm11 = vcmp.eq.s32.totalorder %v274_v40, %v4509_v29 }
  0xde   : > { %2780 = vmatpush.bf16.msra.mxu1 %v4312_v17  ;;  %v4359_v17 = vld [vmem:[%s4477_s28 + $0x7e0] sm:$0xff]  ;;  %vm5072_vm9 = vcmp.eq.s32.totalorder %v272_v34, %v4509_v29  ;;  %vm4097_vm15 = vmpackc.low %vm306_vm11, %vm306_vm11 }
  0xdf   : > { %2793 = vmatpush.bf16.msra.mxu2 %v4320_v18  ;;  %vm4093_vm12 = vmpackc.low %vm5072_vm9, %vm5072_vm9 }
  0xe0   : > { %2806 = vmatpush.bf16.msra.mxu3 %v4328_v19  ;;  %v4334_v19 = vld [vmem:[%s4477_s28 + $0x718] sm:$0xff] }
  0xe1   : > { %2768 = vmatpush.bf16.msra.mxu0 %v4303_v21  ;;  %v2542_v50 = vpop.f32.mrf.mxu2  ;;  %v4350_v21 = vld [vmem:[%s4477_s28 + $0x798] sm:$0xff] }
  0xe2   : > { %2781 = vmatpush.bf16.msra.mxu1 %v4311_v22  ;;  %v2555_v53 = vpop.f32.mrf.mxu3  ;;  %v4358_v22 = vld [vmem:[%s4477_s28 + $0x7d8] sm:$0xff]  ;;  %v4355_v50 = vld [vmem:[%s4477_s28 + $0x7c0] sm:$0xff] }
  0xe3   : > { %2794 = vmatpush.bf16.msra.mxu2 %v4319_v25 }
  0xe4   : > { %2807 = vmatpush.bf16.msra.mxu3 %v4327_v26 }
  0xe5   : > { %2769 = vmatpush.bf16.msra.mxu0 %v4302_v28  ;;  %v4333_v28 = vld [vmem:[%s4477_s28 + $0x710] sm:$0xff] }
  0xe6   : > { %2782 = vmatpush.bf16.msra.mxu1 %v4310_v30  ;;  %v4341_v30 = vld [vmem:[%s4477_s28 + $0x750] sm:$0xff] }
  0xe7   : > { %2795 = vmatpush.bf16.msra.mxu2 %v4318_v31 }
  0xe8   : > { %2808 = vmatpush.bf16.msra.mxu3 %v4326_v32  ;;  %v4349_v32 = vld [vmem:[%s4477_s28 + $0x790] sm:$0xff] }
  0xe9   : > { %2770 = vmatpush.bf16.msra.mxu0 %v4301_v37  ;;  %v273_v37 = vperm.slane %v4983_v43, 5 }
  0xea   : > { %2783 = vmatpush.bf16.msra.mxu1 %v4309_v38  ;;  %v4348_v38 = vld [vmem:[%s4477_s28 + $0x788] sm:$0xff] }
  0xeb   : > { %2796 = vmatpush.bf16.msra.mxu2 %v4317_v41  ;;  %vm5079_vm10 = vcmp.eq.s32.totalorder %v273_v37, %v4509_v29 }
  0xec   : > { %2809 = vmatpush.bf16.msra.mxu3 %v4325_v42  ;;  %v275_v42 = vperm.slane %v4983_v43, 7  ;;  %vm4095_vm14 = vmpackc.low %vm5079_vm10, %vm5079_vm10 }
  0xed   : > { %2771 = vmatpush.bf16.msra.mxu0 %v4300_v44 }
  0xee   : > { %2784 = vmatpush.bf16.msra.mxu1 %v4308_v45  ;;  %vm307_vm13 = vcmp.eq.s32.totalorder %v275_v42, %v4509_v29 }
  0xef   : > { %2797 = vmatpush.bf16.msra.mxu2 %v4316_v47  ;;  %v4339_v47 = vld [vmem:[%s4477_s28 + $0x740] sm:$0xff]  ;;  %vm4099_vm0 = vmpackc.low %vm307_vm13, %vm307_vm13 }
  0xf0   : > { %2810 = vmatpush.bf16.msra.mxu3 %v4324_v48 }
  0xf1   : > { %2772 = vmatpush.bf16.msra.mxu0 %v4299_v55  ;;  %v2566_v11 = vpop.f32.mrf.mxu0 }
  0xf2   : > { %2785 = vmatpush.bf16.msra.mxu1 %v4307_v56  ;;  %v2567_v12 = vadd.f32 %v2566_v11, %v4978_v39  ;;  %v2579_v15 = vpop.f32.mrf.mxu1  ;;  %v4356_v39 = vld [vmem:[%s4477_s28 + $0x7c8] sm:$0xff] }
  0xf3   : > { %2798 = vmatpush.bf16.msra.mxu2 %v4315_v58 }
  0xf4   : > { %2811 = vmatpush.bf16.msra.mxu3 %v4323_v59  ;;  %4086 = vmatmul.msk.bf16.vlgmr.msra.gmra.mxu0 %vm4085_vm4, %v4424_v52  ;;  %v2580_v18 = vadd.f32 %v2579_v15, %v2567_v12 }
  0xf5   : > { %2817 = vmatpush.bf16.msrb.mxu0 %v4338_v61  ;;  %4088 = vmatmul.msk.bf16.vlgmr.msra.gmra.mxu1 %vm4087_vm7, %v4424_v52 }
  0xf6   : > { %2830 = vmatpush.bf16.msrb.mxu1 %v4346_v62  ;;  %4090 = vmatmul.msk.bf16.vlgmr.msra.gmra.mxu2 %vm4089_vm6, %v4424_v52 }
  0xf7   : > { %2843 = vmatpush.bf16.msrb.mxu2 %v4354_v0  ;;  %4092 = vmatmul.msk.bf16.vlgmr.msra.gmra.mxu3 %vm4091_vm8, %v4424_v52 }
  0xf8   : > { %2856 = vmatpush.bf16.msrb.mxu3 %v4362_v1 }
  0xf9   : > { %2818 = vmatpush.bf16.msrb.mxu0 %v4337_v4  ;;  %v2592_v23 = vpop.f32.mrf.mxu2  ;;  %v2568_v26 = vpop.f32.mrf.mxu0 }
  0xfa   : > { %2831 = vmatpush.bf16.msrb.mxu1 %v4345_v5  ;;  %v2593_v24 = vadd.f32 %v2592_v23, %v2580_v18  ;;  %v2605_v25 = vpop.f32.mrf.mxu3  ;;  %v2581_v31 = vpop.f32.mrf.mxu1 }
  0xfb   : > { %2844 = vmatpush.bf16.msrb.mxu2 %v4353_v6 }
  0xfc   : > { %2857 = vmatpush.bf16.msrb.mxu3 %v4361_v7  ;;  %v2606_v27 = vadd.f32 %v2605_v25, %v2593_v24 }
  0xfd   : > { %2819 = vmatpush.bf16.msrb.mxu0 %v4336_v2 }
  0xfe   : > { %2832 = vmatpush.bf16.msrb.mxu1 %v4344_v8 }
  0xff   : > { %2845 = vmatpush.bf16.msrb.mxu2 %v4352_v9 }
 0x100   : > { %2858 = vmatpush.bf16.msrb.mxu3 %v4360_v10 }
 0x101   : > { %2820 = vmatpush.bf16.msrb.mxu0 %v4335_v13  ;;  %v2594_v41 = vpop.f32.mrf.mxu2 }
 0x102   : > { %2833 = vmatpush.bf16.msrb.mxu1 %v4343_v14  ;;  %v2607_v44 = vpop.f32.mrf.mxu3 }
 0x103   : > { %2846 = vmatpush.bf16.msrb.mxu2 %v4351_v16  ;;  %v404_v44 = vld [vmem:[#allocation2] sm:$0xff] }
 0x104   : > { %2859 = vmatpush.bf16.msrb.mxu3 %v4359_v17 }
 0x105   : > { %2821 = vmatpush.bf16.msrb.mxu0 %v4334_v19 }
 0x106   : > { %2834 = vmatpush.bf16.msrb.mxu1 %v4342_v20 }
 0x107   : > { %2847 = vmatpush.bf16.msrb.mxu2 %v4350_v21 }
 0x108   : > { %2860 = vmatpush.bf16.msrb.mxu3 %v4358_v22 }
 0x109   : > { %2822 = vmatpush.bf16.msrb.mxu0 %v4333_v28 }
 0x10a   : > { %2835 = vmatpush.bf16.msrb.mxu1 %v4341_v30 }
 0x10b   : > { %2848 = vmatpush.bf16.msrb.mxu2 %v4349_v32 }
 0x10c   : > { %2861 = vmatpush.bf16.msrb.mxu3 %v4357_v33 }
 0x10d   : > { %2823 = vmatpush.bf16.msrb.mxu0 %v4332_v35 }
 0x10e   : > { %2836 = vmatpush.bf16.msrb.mxu1 %v4340_v36 }
 0x10f   : > { %2849 = vmatpush.bf16.msrb.mxu2 %v4348_v38 }
 0x110   : > { %2862 = vmatpush.bf16.msrb.mxu3 %v4356_v39 }
 0x111   : > { %2824 = vmatpush.bf16.msrb.mxu0 %v4331_v46  ;;  %v2618_v43 = vpop.f32.mrf.mxu0 }
 0x112   : > { %2837 = vmatpush.bf16.msrb.mxu1 %v4339_v47  ;;  %v2619_v29 = vadd.f32 %v2618_v43, %v2606_v27  ;;  %v2631_v51 = vpop.f32.mrf.mxu1 }
 0x113   : > { %2850 = vmatpush.bf16.msrb.mxu2 %v4347_v49 }
 0x114   : > { %2863 = vmatpush.bf16.msrb.mxu3 %v4355_v50  ;;  %4094 = vmatmul.msk.bf16.vlgmr.msrb.gmra.mxu0 %vm4093_vm12, %v4424_v52  ;;  %v2632_v53 = vadd.f32 %v2631_v51, %v2619_v29 }
 0x115   : > { %4096 = vmatmul.msk.bf16.vlgmr.msrb.gmra.mxu1 %vm4095_vm14, %v4424_v52 }
 0x116   : > { %4098 = vmatmul.msk.bf16.vlgmr.msrb.gmra.mxu2 %vm4097_vm15, %v4424_v52 }
 0x117   : > { %4100 = vmatmul.msk.bf16.vlgmr.msrb.gmra.mxu3 %vm4099_vm0, %v4424_v52 }
 0x119   : > { %v2644_v54 = vpop.f32.mrf.mxu2  ;;  %v2620_v57 = vpop.f32.mrf.mxu0 }
 0x11a   : > { %v2645_v55 = vadd.f32 %v2644_v54, %v2632_v53  ;;  %v2657_v56 = vpop.f32.mrf.mxu3  ;;  %v2633_v59 = vpop.f32.mrf.mxu1 }
 0x11c   : > { %v2658_v58 = vadd.f32 %v2657_v56, %v2645_v55 }
 0x121   : > { %v2646_v60 = vpop.f32.mrf.mxu2 }
 0x122   : > { %v2659_v61 = vpop.f32.mrf.mxu3 }
 0x131   : > { %v2670_v62 = vpop.f32.mrf.mxu0 }
 0x132   : > { %v2671_v63 = vadd.f32 %v2670_v62, %v2658_v58  ;;  %v2683_v0 = vpop.f32.mrf.mxu1 }
 0x134   : > { %v2684_v1 = vadd.f32 %v2683_v0, %v2671_v63 }
 0x139   : > { %v2696_v3 = vpop.f32.mrf.mxu2  ;;  %v2672_v52 = vpop.f32.mrf.mxu0 }
 0x13a   : > { %v2697_v4 = vadd.f32 %v2696_v3, %v2684_v1  ;;  %v2709_v5 = vpop.f32.mrf.mxu3  ;;  %v2685_v7 = vpop.f32.mrf.mxu1 }
 0x13c   : > { %v2710_v6 = vadd.f32 %v2709_v5, %v2697_v4 }
 0x141   : > { %v2698_v2 = vpop.f32.mrf.mxu2 }
 0x142   : > { %v2711_v8 = vpop.f32.mrf.mxu3 }
 0x151   : > { %v2722_v9 = vpop.f32.mrf.mxu0 }
 0x152   : > { %v2735_v10 = vpop.f32.mrf.mxu1  ;;  %v2723_v20 = vadd.f32 %v2722_v9, %v2710_v6 }
 0x154   : > { %v2736_v24 = vadd.f32 %v2735_v10, %v2723_v20 }
 0x159   : > { %v2748_v11 = vpop.f32.mrf.mxu2  ;;  %v2724_v13 = vpop.f32.mrf.mxu0 }
 0x15a   : > { %v2761_v12 = vpop.f32.mrf.mxu3  ;;  %v2737_v14 = vpop.f32.mrf.mxu1  ;;  %v2749_v25 = vadd.f32 %v2748_v11, %v2736_v24 }
 0x15c   : > { %v2762_v28 = vadd.f32 %v2761_v12, %v2749_v25 }
 0x161   : > { %v2750_v15 = vpop.f32.mrf.mxu2 }
 0x162   : > { %v2763_v16 = vpop.f32.mrf.mxu3 }
 0x171   : > { %v2774_v17 = vpop.f32.mrf.mxu0 }
 0x172   : > { %v2787_v18 = vpop.f32.mrf.mxu1  ;;  %v2775_v30 = vadd.f32 %v2774_v17, %v2762_v28 }
 0x174   : > { %v2788_v31 = vadd.f32 %v2787_v18, %v2775_v30 }
 0x179   : > { %v2800_v19 = vpop.f32.mrf.mxu2  ;;  %v2776_v22 = vpop.f32.mrf.mxu0 }
 0x17a   : > { %v2813_v21 = vpop.f32.mrf.mxu3  ;;  %v2789_v23 = vpop.f32.mrf.mxu1  ;;  %v2801_v32 = vadd.f32 %v2800_v19, %v2788_v31 }
 0x17c   : > { %v2814_v33 = vadd.f32 %v2813_v21, %v2801_v32 }
 0x181   : > { %v2802_v26 = vpop.f32.mrf.mxu2 }
 0x182   : > { %v2815_v27 = vpop.f32.mrf.mxu3 }
 0x191   : > { %v2826_v34 = vpop.f32.mrf.mxu0 }
 0x192   : > { %v2839_v35 = vpop.f32.mrf.mxu1  ;;  %v2827_v36 = vadd.f32 %v2826_v34, %v2814_v33 }
 0x194   : > { %v2840_v37 = vadd.f32 %v2839_v35, %v2827_v36 }
 0x199   : > { %v2852_v38 = vpop.f32.mrf.mxu2  ;;  %v2828_v41 = vpop.f32.mrf.mxu0 }
 0x19a   : > { %v2865_v39 = vpop.f32.mrf.mxu3  ;;  %v2853_v40 = vadd.f32 %v2852_v38, %v2840_v37  ;;  %v2841_v42 = vpop.f32.mrf.mxu1 }
 0x19c   : > { %v2866_v45 = vadd.f32 %v2865_v39, %v2853_v40 }
 0x19e   : > { %v2869_v46 = vadd.f32 %v2866_v45, %v404_v44  ;;  %2875 = sbr.rel (%p4101_p6) target bundleno = 667 (0x29b), region = 48 }
 0x1a0   : > { %2871 = vst.msk [vmem:[#allocation2] sm:$0xff] %vm2870_vm1, %v2869_v46 }
 0x1a1   : > { %v2854_v47 = vpop.f32.mrf.mxu2 }
 0x1a2   : > { %v2867_v48 = vpop.f32.mrf.mxu3 }
 0x1a3   : > { %v2877_v49 = vld [vmem:[%s5129_s4] sm:$0xff]  ;;  %v2887_v50 = vld [vmem:[%s5127_s2 + $0x18] sm:$0xff]  ;;  %v2886_v43 = vld [vmem:[%s5127_s2 + $0x10] sm:$0xff]  ;;  %v4425_v29 = vmov 0  }
 0x1a4   : > { %4381 = vset.pattern.permute.xlu0 %v4425_v29  ;;  %2907 = vmatpush.msra.mxu0 %v2887_v50  ;;  %v2885_v51 = vld [vmem:[%s5127_s2 + $0x8] sm:$0xff]  ;;  %v2884_v53 = vld [vmem:[%s5127_s2] sm:$0xff] }
 0x1a5   : > { %2880 = vperm.xlu0 %4381, %v2877_v49   ;;  %v4382_v57 = vld [vmem:[%s5128_s3] ss:$0 sm:$0xff] }
 0x1a6   : > { %2908 = vmatpush.msra.mxu0 %v2886_v43 }
 0x1a7   : > { %v2876_v54 = vld [vmem:[#allocation2] sm:$0xff] }
 0x1a8   : > { %2909 = vmatpush.msra.mxu0 %v2885_v51 }
 0x1aa   : > { %2910 = vmatpush.msra.mxu0 %v2884_v53 }
 0x217   : > { %v2881_v55 = vpop.permute.xlu0 %2880 }
 0x218   : > { %v2883_v56 = vmul.f32 %v2881_v55, %v2876_v54 }
 0x21a   : > { %4102 = vmatmul.msk.f32.vlgmr.msra.gmra.mxu0 %vm2870_vm1, %v2883_v56 }
 0x297   : > { %v2912_v58 = vpop.f32.mrf.mxu0 }
 0x298   : > { %v2913_v59 = vadd.f32 %v4382_v57, %v2912_v58 }
 0x29a   : > { %2915 = vst [vmem:[#allocation3] sm:$0xff] %v2913_v59 }
 0x29b PF: > { %p4367_p7 = scmp.eq.s32.totalorder %s4463_s19, 2  ;;  %s4426_s16 = smov [#allocation3]  }
 0x29c   : > { %s2922_s17 = sshll.u32 %s4426_s16, 4  ;;  %s2924_s22 = sshll.u32 %s5130_s5, 4  ;;  %s2923_s17 = int_to_ptr.vmem [resolvable:$true] %s2922_s17  ;;  %s2925_s22 = int_to_ptr.hbm [resolvable:$true] %s2924_s22 }
 0x29d   : > { %4364 = dma.vmem_to_hbm [thread:$0]  (%p4367_p7), %s2923_s17, 128, %s2925_s22, [#allocation4]  }
 0x29e   : > { %4416 = dma.done.wait (%p4367_p7), [#allocation4], 128  }
 0x29f   : > { %4418 = vsyncadd (%p4367_p7), [#allocation4], 4294967168 }
 0x2a0 PF: > { %s16_s18 = sadd.s32 1, %s4421_s18  }
 0x2a1   : > { %p13_p8 = scmp.ge.s32.totalorder %s16_s18, 5  }
 0x2a3   :  { %15 = sbr.rel (!%p13_p8) target bundleno = 1 (0x1), region = 78 }
 0x2a8   :  { %2938 = vsyncpa [#allocation4], 1 }
 0x2a9   :  { %2940 = vsyncpa [#allocation4 + $0x1], 1 }

</bundles_post_ra>
